<compile_context>
chip_gen: v7x
topology: tpu7x:2x2x1
jax: 0.10.0
libtpu: 0.0.40
codegen_flags: <defaults>
</compile_context>

<pallas_src>
import functools

import jax
import jax.numpy as jnp
from jax.experimental import pallas as pl
from jax.experimental.pallas import tpu as pltpu

BN_EPS = 1e-5
LEAKY_SLOPE = 0.1
LANE = 128


def _round_up(n, m):
    return (n + m - 1) // m * m


def _ladder_decoder_kernel(
    x_ref,        # (TB, Z1)      f32  (cast to bf16 in-kernel)
    w1_ref,       # (Z1, Hp)      bf16
    gamma_ref,    # (1, Hp)       f32
    beta_ref,     # (1, Hp)       f32
    whead_ref,    # (Hp, 2*Z2p)   bf16  [wmu | wvar]
    bhead_ref,    # (1, 2*Z2p)    f32   [bmu | bvar]
    mu_ref,       # (TB, Z2p)     f32
    var_ref,      # (TB, Z2p)     f32
    sum_ref,      # (1, Hp)       f32 scratch: column sums of h
    sq_ref,       # (1, Hp)       f32 scratch: column sums of h*h
    *,
    inv_b,        # static: 1 / real_batch
    z2p,          # static: padded width of each head half (multiple of 128)
):
    phase = pl.program_id(0)
    btile = pl.program_id(1)

    @pl.when((phase == 0) & (btile == 0))
    def _init_stats():
        sum_ref[...] = jnp.zeros_like(sum_ref)
        sq_ref[...] = jnp.zeros_like(sq_ref)

    # ---- Linear 1 on the MXU (bf16 operands, f32 accumulation).  The
    # Linear-1 bias is dropped: BatchNorm's mean subtraction cancels it.
    h = jnp.dot(x_ref[...].astype(jnp.bfloat16), w1_ref[...],
                preferred_element_type=jnp.float32)          # (TB, Hp) f32

    @pl.when(phase == 0)
    def _accumulate_stats():
        # Unmasked sum / sum-of-squares: zero-padded batch rows of x give
        # exactly-zero rows of h (no bias), so they contribute nothing.
        sum_ref[...] += jnp.sum(h, axis=0, keepdims=True)
        sq_ref[...] += jnp.sum(h * h, axis=0, keepdims=True)

    @pl.when(phase == 1)
    def _normalize_and_heads():
        # BatchNorm1d (training mode, biased batch stats over the real rows).
        mean = sum_ref[...] * inv_b
        var_b = sq_ref[...] * inv_b - mean * mean            # E[h^2] - E[h]^2
        # gamma folded into the normalization scale -> single (TB,Hp) FMA.
        scale = gamma_ref[...] * jax.lax.rsqrt(var_b + BN_EPS)
        shift = beta_ref[...] - mean * scale
        hn = h * scale + shift
        # LeakyReLU(0.1)
        hn = jnp.where(hn >= 0.0, hn, LEAKY_SLOPE * hn)

        # Fused heads: one lane-dense MXU matmul producing [mu | pre_var].
        heads = jnp.dot(hn.astype(jnp.bfloat16), whead_ref[...],
                        preferred_element_type=jnp.float32) + bhead_ref[...]
        mu_ref[...] = heads[:, :z2p]
        pre_var = heads[:, z2p:]
        # softplus (numerically stable; matches F.softplus threshold=20)
        var_ref[...] = jnp.where(
            pre_var > 20.0, pre_var,
            jnp.log1p(jnp.exp(jnp.minimum(pre_var, 20.0))))


def prepare_params(params):
    """Pad feature dims to 128 lanes and pre-cast matmul weights to bf16.

    Call ONCE (e.g. at init) and reuse the result: all padding / casting is
    hoisted out of the per-call path.  params["b1"] is intentionally unused —
    BatchNorm's mean subtraction cancels any per-feature bias on its input.
    """
    w1 = params["w1"]
    z1, h_dim = w1.shape
    z2 = params["wmu"].shape[1]
    hp = _round_up(h_dim, LANE)
    z2p = _round_up(z2, LANE)

    w1_p = jnp.zeros((z1, hp), jnp.float32).at[:, :h_dim].set(w1)
    gamma_p = jnp.zeros((1, hp), jnp.float32).at[0, :h_dim].set(params["gamma"])
    beta_p = jnp.zeros((1, hp), jnp.float32).at[0, :h_dim].set(params["beta"])
    whead_p = (jnp.zeros((hp, 2 * z2p), jnp.float32)
               .at[:h_dim, :z2].set(params["wmu"])
               .at[:h_dim, z2p:z2p + z2].set(params["wvar"]))
    bhead_p = (jnp.zeros((1, 2 * z2p), jnp.float32)
               .at[0, :z2].set(params["bmu"])
               .at[0, z2p:z2p + z2].set(params["bvar"]))

    return dict(
        w1=w1_p.astype(jnp.bfloat16),
        gamma=gamma_p,
        beta=beta_p,
        whead=whead_p.astype(jnp.bfloat16),
        bhead=bhead_p,
        dims=(z1, h_dim, z2, hp, z2p),
    )


def _pick_batch_tile(b, hp):
    """Power-of-two batch tile (>=8) keeping the per-tile h (f32) <= ~4 MiB so
    the working set fits every chip's default scoped-VMEM limit."""
    tb = 8
    while tb < 512 and tb < _round_up(b, 8) and (2 * tb) * hp * 4 <= (4 << 20):
        tb *= 2
    return tb


def ladder_decoder(x, prep):
    """x: (B, z1_dim) f32.  prep: output of prepare_params()."""
    z1, h_dim, z2, hp, z2p = prep["dims"]
    b = x.shape[0]

    tb = _pick_batch_tile(b, hp)
    bp = _round_up(b, tb)
    nb = bp // tb
    if bp != b:
        # Batch-only zero padding (inert: zero rows of h, 1/b used for stats).
        x = jnp.pad(x, ((0, bp - b), (0, 0)))

    kernel = functools.partial(_ladder_decoder_kernel, inv_b=1.0 / b, z2p=z2p)

    const = lambda p, i: (0, 0)        # resident weights
    xy_map = lambda p, i: (i, 0)       # batch-tiled input
    # Outputs: park on block 0 during phase 0 (never written, never flushed
    # mid-phase), then follow the batch tiles in phase 1.
    out_map = lambda p, i: (p * i, 0)

    flops = 4 * bp * z1 * hp + 2 * bp * hp * (2 * z2p)
    bytes_accessed = (2 * bp * z1 * 4 + z1 * hp * 2 + hp * 2 * z2p * 2
                      + (2 * hp + 2 * z2p) * 4 + bp * 2 * z2p * 4)

    mu_p, var_p = pl.pallas_call(
        kernel,
        out_shape=(jax.ShapeDtypeStruct((bp, z2p), jnp.float32),
                   jax.ShapeDtypeStruct((bp, z2p), jnp.float32)),
        grid_spec=pltpu.PrefetchScalarGridSpec(
            num_scalar_prefetch=0,
            grid=(2, nb),                       # (phase, batch tile)
            in_specs=[
                pl.BlockSpec((tb, z1), xy_map),
                pl.BlockSpec((z1, hp), const),
                pl.BlockSpec((1, hp), const),
                pl.BlockSpec((1, hp), const),
                pl.BlockSpec((hp, 2 * z2p), const),
                pl.BlockSpec((1, 2 * z2p), const),
            ],
            out_specs=[
                pl.BlockSpec((tb, z2p), out_map),
                pl.BlockSpec((tb, z2p), out_map),
            ],
            scratch_shapes=[
                pltpu.VMEM((1, hp), jnp.float32),   # column sum of h
                pltpu.VMEM((1, hp), jnp.float32),   # column sum of h*h
            ],
        ),
        compiler_params=pltpu.CompilerParams(
            # Phase must run in order and the batch axis carries the shared
            # stats scratch -> both "arbitrary".
            dimension_semantics=("arbitrary", "arbitrary")),
        cost_estimate=pl.CostEstimate(
            flops=flops,
            transcendentals=bp * z2p + hp,
            bytes_accessed=bytes_accessed),
    )(x, prep["w1"], prep["gamma"], prep["beta"], prep["whead"], prep["bhead"])

    return mu_p[:b, :z2], var_p[:b, :z2]


def init_params(key, z1_dim, hidden_dim, z2_dim):
    """Deterministic synthetic parameters (shapes match nn.Linear / BatchNorm1d)."""
    ks = jax.random.split(key, 6)

    def linear(kw, kb, fan_in, fan_out):
        bound = 1.0 / jnp.sqrt(fan_in)
        # stored transposed: (in, out)
        w = jax.random.uniform(kw, (fan_in, fan_out), jnp.float32, -bound, bound)
        b = jax.random.uniform(kb, (fan_out,), jnp.float32, -bound, bound)
        return w, b

    w1, b1 = linear(ks[0], ks[1], z1_dim, hidden_dim)
    wmu, bmu = linear(ks[2], ks[3], hidden_dim, z2_dim)
    wvar, bvar = linear(ks[4], ks[5], hidden_dim, z2_dim)
    gamma = jnp.ones((hidden_dim,), jnp.float32)
    beta = jnp.zeros((hidden_dim,), jnp.float32)
    return dict(w1=w1, b1=b1, gamma=gamma, beta=beta,
                wmu=wmu, bmu=bmu, wvar=wvar, bvar=bvar)


def reference(x, p):
    """Pure-JAX f32 reference (matches the PyTorch forward, training-mode BN)."""
    h = x @ p["w1"] + p["b1"]
    mean = h.mean(axis=0, keepdims=True)
    varb = ((h - mean) ** 2).mean(axis=0, keepdims=True)
    h = (h - mean) / jnp.sqrt(varb + BN_EPS) * p["gamma"] + p["beta"]
    h = jnp.where(h >= 0, h, LEAKY_SLOPE * h)
    mu = h @ p["wmu"] + p["bmu"]
    var = jax.nn.softplus(h @ p["wvar"] + p["bvar"])
    return mu, var


if __name__ == "__main__":
    key = jax.random.PRNGKey(0)
    k_x, k_p = jax.random.split(key)

    B, Z1, H, Z2 = 8, 16, 32, 8
    x = jax.random.normal(k_x, (B, Z1), jnp.float32)
    params = init_params(k_p, Z1, H, Z2)
    prep = prepare_params(params)          # once, outside the per-call path

    mu, var = ladder_decoder(x, prep)
    jax.block_until_ready((mu, var))

    mu_ref, var_ref = reference(x, params)
    assert mu.shape == (B, Z2) and var.shape == (B, Z2)
    # bf16 MXU operands (f32 accumulation) -> looser tolerance than pure f32.
    assert jnp.allclose(mu, mu_ref, atol=5e-2, rtol=5e-2), "mu mismatch"
    assert jnp.allclose(var, var_ref, atol=5e-2, rtol=5e-2), "var mismatch"

    print("KERNEL_OK")
</pallas_src>

<mosaic_0001>
module attributes {stable_mosaic.version = 11 : i64} {
  func.func @_ladder_decoder_kernel(%arg0: i32, %arg1: i32, %arg2: memref<8x16xf32, #tpu.memory_space<vmem>>, %arg3: memref<16x128xbf16, #tpu.memory_space<vmem>>, %arg4: memref<1x128xf32, #tpu.memory_space<vmem>>, %arg5: memref<1x128xf32, #tpu.memory_space<vmem>>, %arg6: memref<128x256xbf16, #tpu.memory_space<vmem>>, %arg7: memref<1x256xf32, #tpu.memory_space<vmem>>, %arg8: memref<8x128xf32, #tpu.memory_space<vmem>>, %arg9: memref<8x128xf32, #tpu.memory_space<vmem>>, %arg10: memref<1x128xf32, #tpu.memory_space<vmem>>, %arg11: memref<1x128xf32, #tpu.memory_space<vmem>>) attributes {dimension_semantics = [#tpu.dimension_semantics<arbitrary>, #tpu.dimension_semantics<arbitrary>], iteration_bounds = array<i64: 2, 1>, scalar_prefetch = 0 : i64, scratch_operands = 2 : i64, tpu.core_type = #tpu.core_type<tc>, window_params = [{transform_indices = @transform_0, window_bounds = array<i64: 8, 16>}, {pipeline_mode = #tpu.pipeline_mode<synchronous>, transform_indices = @transform_1, window_bounds = array<i64: 16, 128>}, {pipeline_mode = #tpu.pipeline_mode<synchronous>, transform_indices = @transform_2, window_bounds = array<i64: 1, 128>}, {pipeline_mode = #tpu.pipeline_mode<synchronous>, transform_indices = @transform_3, window_bounds = array<i64: 1, 128>}, {pipeline_mode = #tpu.pipeline_mode<synchronous>, transform_indices = @transform_4, window_bounds = array<i64: 128, 256>}, {pipeline_mode = #tpu.pipeline_mode<synchronous>, transform_indices = @transform_5, window_bounds = array<i64: 1, 256>}, {transform_indices = @transform_6, window_bounds = array<i64: 8, 128>}, {transform_indices = @transform_7, window_bounds = array<i64: 8, 128>}]} {
    %c0_i32 = arith.constant 0 : i32
    %0 = arith.cmpi eq, %arg0, %c0_i32 : i32
    %c0_i32_0 = arith.constant 0 : i32
    %1 = arith.cmpi eq, %arg1, %c0_i32_0 : i32
    %2 = arith.andi %0, %1 : i1
    %3 = arith.extui %2 : i1 to i32
    %c0_i32_1 = arith.constant 0 : i32
    %4 = arith.cmpi ne, %3, %c0_i32_1 : i32
    scf.if %4 {
      %cst_8 = arith.constant 0.000000e+00 : f32
      %15 = vector.broadcast %cst_8 : f32 to vector<1x128xf32>
      %c0_9 = arith.constant 0 : index
      %c0_10 = arith.constant 0 : index
      %16 = vector.load %arg10[%c0_9, %c0_10] : memref<1x128xf32, #tpu.memory_space<vmem>>, vector<1x128xf32>
      tpu.vector_store %arg10[%c0_9, %c0_10], %15 {strides = array<i32>} : memref<1x128xf32, #tpu.memory_space<vmem>>, vector<1x128xf32>,
      %cst_11 = arith.constant 0.000000e+00 : f32
      %17 = vector.broadcast %cst_11 : f32 to vector<1x128xf32>
      %c0_12 = arith.constant 0 : index
      %c0_13 = arith.constant 0 : index
      %18 = vector.load %arg11[%c0_12, %c0_13] : memref<1x128xf32, #tpu.memory_space<vmem>>, vector<1x128xf32>
      tpu.vector_store %arg11[%c0_12, %c0_13], %17 {strides = array<i32>} : memref<1x128xf32, #tpu.memory_space<vmem>>, vector<1x128xf32>,
    } else {
    }
    %c0 = arith.constant 0 : index
    %c0_2 = arith.constant 0 : index
    %5 = vector.load %arg2[%c0, %c0_2] : memref<8x16xf32, #tpu.memory_space<vmem>>, vector<8x16xf32>
    %6 = arith.truncf %5 : vector<8x16xf32> to vector<8x16xbf16>
    %c0_3 = arith.constant 0 : index
    %c0_4 = arith.constant 0 : index
    %7 = vector.load %arg3[%c0_3, %c0_4] : memref<16x128xbf16, #tpu.memory_space<vmem>>, vector<16x128xbf16>
    %cst = arith.constant dense<0.000000e+00> : vector<8x128xf32>
    %8 = tpu.matmul %6, %7, %cst {dimension_numbers = #tpu.dot_dimension_numbers<[1], [0], [0], [1], [0, 0, 1, 1], [], []>} : vector<8x16xbf16>, vector<16x128xbf16>, vector<8x128xf32> -> vector<8x128xf32>
    %c0_i32_5 = arith.constant 0 : i32
    %9 = arith.cmpi eq, %arg0, %c0_i32_5 : i32
    %10 = arith.extui %9 : i1 to i32
    %c0_i32_6 = arith.constant 0 : i32
    %11 = arith.cmpi ne, %10, %c0_i32_6 : i32
    scf.if %11 {
      %c0_8 = arith.constant 0 : index
      %c0_9 = arith.constant 0 : index
      %15 = vector.load %arg10[%c0_8, %c0_9] : memref<1x128xf32, #tpu.memory_space<vmem>>, vector<1x128xf32>
      %cst_10 = arith.constant dense<0.000000e+00> : vector<128xf32>
      %16 = vector.multi_reduction <add>, %8, %cst_10 [0] : vector<8x128xf32> to vector<128xf32>
      %17 = vector.shape_cast %16 : vector<128xf32> to vector<1x128xf32>
      %18 = arith.addf %15, %17 : vector<1x128xf32>
      %c0_11 = arith.constant 0 : index
      %c0_12 = arith.constant 0 : index
      %19 = vector.load %arg10[%c0_11, %c0_12] : memref<1x128xf32, #tpu.memory_space<vmem>>, vector<1x128xf32>
      tpu.vector_store %arg10[%c0_11, %c0_12], %18 {strides = array<i32>} : memref<1x128xf32, #tpu.memory_space<vmem>>, vector<1x128xf32>,
      %c0_13 = arith.constant 0 : index
      %c0_14 = arith.constant 0 : index
      %20 = vector.load %arg11[%c0_13, %c0_14] : memref<1x128xf32, #tpu.memory_space<vmem>>, vector<1x128xf32>
      %21 = arith.mulf %8, %8 : vector<8x128xf32>
      %cst_15 = arith.constant dense<0.000000e+00> : vector<128xf32>
      %22 = vector.multi_reduction <add>, %21, %cst_15 [0] : vector<8x128xf32> to vector<128xf32>
      %23 = vector.shape_cast %22 : vector<128xf32> to vector<1x128xf32>
      %24 = arith.addf %20, %23 : vector<1x128xf32>
      %c0_16 = arith.constant 0 : index
      %c0_17 = arith.constant 0 : index
      %25 = vector.load %arg11[%c0_16, %c0_17] : memref<1x128xf32, #tpu.memory_space<vmem>>, vector<1x128xf32>
      tpu.vector_store %arg11[%c0_16, %c0_17], %24 {strides = array<i32>} : memref<1x128xf32, #tpu.memory_space<vmem>>, vector<1x128xf32>,
    } else {
    }
    %c1_i32 = arith.constant 1 : i32
    %12 = arith.cmpi eq, %arg0, %c1_i32 : i32
    %13 = arith.extui %12 : i1 to i32
    %c0_i32_7 = arith.constant 0 : i32
    %14 = arith.cmpi ne, %13, %c0_i32_7 : i32
    scf.if %14 {
      %c0_8 = arith.constant 0 : index
      %c0_9 = arith.constant 0 : index
      %15 = vector.load %arg10[%c0_8, %c0_9] : memref<1x128xf32, #tpu.memory_space<vmem>>, vector<1x128xf32>
      %cst_10 = arith.constant 1.250000e-01 : f32
      %16 = vector.broadcast %cst_10 : f32 to vector<1x128xf32>
      %17 = arith.mulf %15, %16 : vector<1x128xf32>
      %c0_11 = arith.constant 0 : index
      %c0_12 = arith.constant 0 : index
      %18 = vector.load %arg11[%c0_11, %c0_12] : memref<1x128xf32, #tpu.memory_space<vmem>>, vector<1x128xf32>
      %cst_13 = arith.constant 1.250000e-01 : f32
      %19 = vector.broadcast %cst_13 : f32 to vector<1x128xf32>
      %20 = arith.mulf %18, %19 : vector<1x128xf32>
      %21 = arith.mulf %17, %17 : vector<1x128xf32>
      %22 = arith.subf %20, %21 : vector<1x128xf32>
      %c0_14 = arith.constant 0 : index
      %c0_15 = arith.constant 0 : index
      %23 = vector.load %arg4[%c0_14, %c0_15] : memref<1x128xf32, #tpu.memory_space<vmem>>, vector<1x128xf32>
      %cst_16 = arith.constant 9.99999974E-6 : f32
      %24 = vector.broadcast %cst_16 : f32 to vector<1x128xf32>
      %25 = arith.addf %22, %24 : vector<1x128xf32>
      %26 = math.rsqrt %25 : vector<1x128xf32>
      %27 = arith.mulf %23, %26 : vector<1x128xf32>
      %c0_17 = arith.constant 0 : index
      %c0_18 = arith.constant 0 : index
      %28 = vector.load %arg5[%c0_17, %c0_18] : memref<1x128xf32, #tpu.memory_space<vmem>>, vector<1x128xf32>
      %29 = arith.mulf %17, %27 : vector<1x128xf32>
      %30 = arith.subf %28, %29 : vector<1x128xf32>
      %31 = vector.broadcast %27 : vector<1x128xf32> to vector<8x128xf32>
      %32 = arith.mulf %8, %31 : vector<8x128xf32>
      %33 = vector.broadcast %30 : vector<1x128xf32> to vector<8x128xf32>
      %34 = arith.addf %32, %33 : vector<8x128xf32>
      %cst_19 = arith.constant 0.000000e+00 : f32
      %35 = vector.broadcast %cst_19 : f32 to vector<8x128xf32>
      %36 = arith.cmpf oge, %34, %35 : vector<8x128xf32>
      %cst_20 = arith.constant 1.000000e-01 : f32
      %37 = vector.broadcast %cst_20 : f32 to vector<8x128xf32>
      %38 = arith.mulf %37, %34 : vector<8x128xf32>
      %39 = arith.select %36, %34, %38 : vector<8x128xi1>, vector<8x128xf32>
      %40 = arith.truncf %39 : vector<8x128xf32> to vector<8x128xbf16>
      %c0_21 = arith.constant 0 : index
      %c0_22 = arith.constant 0 : index
      %41 = vector.load %arg6[%c0_21, %c0_22] : memref<128x256xbf16, #tpu.memory_space<vmem>>, vector<128x256xbf16>
      %cst_23 = arith.constant dense<0.000000e+00> : vector<8x256xf32>
      %42 = tpu.matmul %40, %41, %cst_23 {dimension_numbers = #tpu.dot_dimension_numbers<[1], [0], [0], [1], [0, 0, 1, 1], [], []>} : vector<8x128xbf16>, vector<128x256xbf16>, vector<8x256xf32> -> vector<8x256xf32>
      %c0_24 = arith.constant 0 : index
      %c0_25 = arith.constant 0 : index
      %43 = vector.load %arg7[%c0_24, %c0_25] : memref<1x256xf32, #tpu.memory_space<vmem>>, vector<1x256xf32>
      %44 = vector.broadcast %43 : vector<1x256xf32> to vector<8x256xf32>
      %45 = arith.addf %42, %44 : vector<8x256xf32>
      %46 = vector.extract_strided_slice %45 {offsets = [0, 0], sizes = [8, 128], strides = [1, 1]} : vector<8x256xf32> to vector<8x128xf32>
      %c0_26 = arith.constant 0 : index
      %c0_27 = arith.constant 0 : index
      %47 = vector.load %arg8[%c0_26, %c0_27] : memref<8x128xf32, #tpu.memory_space<vmem>>, vector<8x128xf32>
      tpu.vector_store %arg8[%c0_26, %c0_27], %46 {strides = array<i32>} : memref<8x128xf32, #tpu.memory_space<vmem>>, vector<8x128xf32>,
      %48 = vector.extract_strided_slice %45 {offsets = [0, 128], sizes = [8, 128], strides = [1, 1]} : vector<8x256xf32> to vector<8x128xf32>
      %cst_28 = arith.constant 2.000000e+01 : f32
      %49 = vector.broadcast %cst_28 : f32 to vector<8x128xf32>
      %50 = arith.cmpf ogt, %48, %49 : vector<8x128xf32>
      %cst_29 = arith.constant 2.000000e+01 : f32
      %51 = vector.broadcast %cst_29 : f32 to vector<8x128xf32>
      %52 = arith.minimumf %48, %51 : vector<8x128xf32>
      %53 = math.exp %52 : vector<8x128xf32>
      %54 = math.log1p %53 : vector<8x128xf32>
      %55 = arith.select %50, %48, %54 : vector<8x128xi1>, vector<8x128xf32>
      %c0_30 = arith.constant 0 : index
      %c0_31 = arith.constant 0 : index
      %56 = vector.load %arg9[%c0_30, %c0_31] : memref<8x128xf32, #tpu.memory_space<vmem>>, vector<8x128xf32>
      tpu.vector_store %arg9[%c0_30, %c0_31], %55 {strides = array<i32>} : memref<8x128xf32, #tpu.memory_space<vmem>>, vector<8x128xf32>,
    } else {
    }
    return
  }
  func.func @transform_0(%arg0: i32, %arg1: i32) -> (i32, i32) {
    %c0_i32 = arith.constant 0 : i32
    %c0_i32_0 = arith.constant 0 : i32
    return %arg1, %c0_i32 : i32, i32
  }
  func.func @transform_1(%arg0: i32, %arg1: i32) -> (i32, i32) {
    %c0_i32 = arith.constant 0 : i32
    %c0_i32_0 = arith.constant 0 : i32
    %c0_i32_1 = arith.constant 0 : i32
    return %c0_i32, %c0_i32_0 : i32, i32
  }
  func.func @transform_2(%arg0: i32, %arg1: i32) -> (i32, i32) {
    %c0_i32 = arith.constant 0 : i32
    %c0_i32_0 = arith.constant 0 : i32
    %c0_i32_1 = arith.constant 0 : i32
    return %c0_i32, %c0_i32_0 : i32, i32
  }
  func.func @transform_3(%arg0: i32, %arg1: i32) -> (i32, i32) {
    %c0_i32 = arith.constant 0 : i32
    %c0_i32_0 = arith.constant 0 : i32
    %c0_i32_1 = arith.constant 0 : i32
    return %c0_i32, %c0_i32_0 : i32, i32
  }
  func.func @transform_4(%arg0: i32, %arg1: i32) -> (i32, i32) {
    %c0_i32 = arith.constant 0 : i32
    %c0_i32_0 = arith.constant 0 : i32
    %c0_i32_1 = arith.constant 0 : i32
    return %c0_i32, %c0_i32_0 : i32, i32
  }
  func.func @transform_5(%arg0: i32, %arg1: i32) -> (i32, i32) {
    %c0_i32 = arith.constant 0 : i32
    %c0_i32_0 = arith.constant 0 : i32
    %c0_i32_1 = arith.constant 0 : i32
    return %c0_i32, %c0_i32_0 : i32, i32
  }
  func.func @transform_6(%arg0: i32, %arg1: i32) -> (i32, i32) {
    %0 = arith.muli %arg0, %arg1 : i32
    %c0_i32 = arith.constant 0 : i32
    %c0_i32_0 = arith.constant 0 : i32
    return %0, %c0_i32 : i32, i32
  }
  func.func @transform_7(%arg0: i32, %arg1: i32) -> (i32, i32) {
    %0 = arith.muli %arg0, %arg1 : i32
    %c0_i32 = arith.constant 0 : i32
    %c0_i32_0 = arith.constant 0 : i32
    return %0, %c0_i32 : i32, i32
  }
}

</mosaic_0001>

<bundles_post_ra>
// kernel: tpu_custom_call.1
= control target key start
LH: loop header
LB: loop body
LE: loop exit
PB: predicated region body
PF: predicated region fallthrough
CT: control target
= control target key end

     0   :  { %13 = vsyncpa [#allocation5], 0  ;;  %s1362_s0 = inlined_call_operand.hbm [shape: f32[8,16], index: 0, kind: input, shape index: {}]   ;;  %s1363_s1 = inlined_call_operand.hbm [shape: bf16[16,128], index: 1, kind: input, shape index: {}]   ;;  %s1364_s2 = inlined_call_operand.vmem [shape: f32[1,128], index: 2, kind: input, shape index: {}]   ;;  %s1365_s3 = inlined_call_operand.vmem [shape: f32[1,128], index: 3, kind: input, shape index: {}]   ;;  %s1366_s4 = inlined_call_operand.hbm [shape: bf16[128,256], index: 4, kind: input, shape index: {}]   ;;  %s1367_s5 = inlined_call_operand.vmem [shape: f32[1,256], index: 5, kind: input, shape index: {}]   ;;  %s1368_s6 = inlined_call_operand.hbm [shape: f32[8,128], index: 6, kind: output, shape index: {0}]   ;;  %s1369_s7 = inlined_call_operand.hbm [shape: f32[8,128], index: 7, kind: output, shape index: {1}]  }
   0x1   :  { %14 = vsyncpa [#allocation8], 0 }
   0x2   :  { %15 = vsyncpa [#allocation6], 0 }
   0x3   :  { %17 = vsyncpa [#allocation6 + $0x1], 0 }
   0x4   :  { %18 = vsyncpa [#allocation12], 0 }
   0x5   :  { %20 = vsyncpa [#allocation12 + $0x1], 0  ;;  %s1165_s24 = smov 0   ;;  %s1167_s25 = smov 0  }
   0x6   :  { %s1169_s26 = smov 0  }
   0x7 LB: > { %s1112_s27 = smov [#allocation7]   ;;  %s1373_s29 = sadd.s32 4294967295, %s1110_s26   ;;  %s1110_s26 = sphi %s1169_s26, %s26_s26   ;;  %s1106_s25 = sphi %s1167_s25, %s1386_s25   ;;  %s1102_s24 = sphi %s1165_s24, %s1385_s24  }
   0x8   : > { %s255_s28 = sshll.u32 %s1112_s27, 4  ;;  %p776_p0 = scmp.ge.s32.totalorder %s1110_s26, 1  ;;  %s256_s28 = int_to_ptr.vmem [resolvable:$true] %s255_s28 }
   0x9   : > { %p230_p1 = scmp.lt.s32.totalorder %s1110_s26, 3  ;;  %p1186_p2 = scmp.eq.s32.totalorder %s1373_s29, 0 }
   0xa   : > { %s38_s11 = sadd.s32 1, %s1106_s25  ;;  %s936_s15 = scalar_lea.hbm %s1363_s1, 128 }
   0xb   : > { %s1374_s8 = scalar_select %p1186_p2, 1, 0 }
   0xc   : > { %p1190_p3 = pnand %p776_p0, %p230_p1  ;;  %p1203_p6 = scmp.ge.s32.totalorder %s38_s11, 2 }
   0xd   : > { %p937_p7 = scmp.ne.s32.totalorder %s1363_s1, %s936_s15  ;;  %p943_p11 = scmp.lt.u32.totalorder %s936_s15, %s1363_s1 }
   0xe   : > { %s1375_s9 = scalar_select %p1190_p3, 1, 0 }
   0xf   : > { %p840_p4 = pneg %p1190_p3 }
  0x10   : > { %s1377_s12 = scalar_select %p1203_p6, 1, 0 }
  0x11   : > { %p1198_p5 = pnand %p1186_p2, %p840_p4 }
  0x13   : > { %p1215_p8 = pneg %p1198_p5 }
  0x15   : > { %p939_p9 = pnand %p1215_p8, %p937_p7 }
  0x17   : > { %p940_p10 = pneg %p939_p9 }
  0x19   : > { %p945_p12 = pnand %p943_p11, %p940_p10 }
  0x1b   : > { %948 = shalt.err (!%p945_p12)
}
  0x1c   : > { %s949_s21 = scalar_lea.vmem %s256_s28, 128  ;;  %p957_p4 = scmp.lt.s32.totalorder %s256_s28, %s256_s28 }
  0x1d   : > { %p950_p13 = scmp.ne.s32.totalorder %s256_s28, %s949_s21  ;;  %p958_p2 = scmp.lt.s32.totalorder %s949_s21, %s949_s21 }
  0x1f   : > { %p952_p0 = pnand %p950_p13, %p1215_p8  ;;  %p959_p3 = por %p958_p2, %p957_p4 }
  0x21   : > { %p953_p1 = pneg %p952_p0 }
  0x23   : > { %p960_p6 = pnand %p959_p3, %p953_p1 }
  0x25   : > { %963 = shalt.err (!%p960_p6)
}
  0x26   : > { %s1113_s22 = smov 64   ;;  %s1114_s23 = smov 4  }
  0x27   : > { %846 = dma.hbm_to_vmem [thread:$0]  (!%p1198_p5), %s1363_s1, 128, %s256_s28, [#allocation8], %s1113_s22, %s1113_s22, %s1114_s23  }
  0x28   : > { %p1379_p7 = scmp.ne.s32.totalorder %s1377_s12, 0  ;;  %s1115_s14 = smov [#allocation4]  }
  0x29   : > { %s245_s15 = sshll.u32 %s1115_s14, 4  ;;  %s1116_s16 = smov [#allocation9]   ;;  %s246_s15 = int_to_ptr.vmem [resolvable:$true] %s245_s15 }
  0x2a   : > { %s1388_s11 = smov (%p1379_p7, %s38_s11), 0  ;;  %s274_s17 = sshll.u32 %s1116_s16, 4  ;;  %s275_s17 = int_to_ptr.vmem [resolvable:$true] %s274_s17 }
  0x2b   : > { %s964_s21 = scalar_lea.hbm %s1362_s0, 128 }
  0x2c   : > { %p965_p2 = scmp.ne.s32.totalorder %s1362_s0, %s964_s21  ;;  %p971_p9 = scmp.lt.u32.totalorder %s964_s21, %s1362_s0 }
  0x2e   : > { %p967_p3 = pnand %p965_p2, %p1215_p8 }
  0x30   : > { %p968_p6 = pneg %p967_p3 }
  0x32   : > { %p973_p10 = pnand %p971_p9, %p968_p6 }
  0x34   : > { %976 = shalt.err (!%p973_p10)
}
  0x35   : > { %s977_s22 = scalar_lea.vmem %s246_s15, 128  ;;  %p985_p0 = scmp.lt.s32.totalorder %s246_s15, %s246_s15 }
  0x36   : > { %p978_p11 = scmp.ne.s32.totalorder %s246_s15, %s977_s22  ;;  %p986_p1 = scmp.lt.s32.totalorder %s977_s22, %s977_s22 }
  0x38   : > { %p980_p12 = pnand %p978_p11, %p1215_p8  ;;  %p987_p4 = por %p986_p1, %p985_p0 }
  0x3a   : > { %p981_p13 = pneg %p980_p12 }
  0x3c   : > { %p988_p7 = pnand %p987_p4, %p981_p13 }
  0x3e   : > { %991 = shalt.err (!%p988_p7)
}
  0x3f   : > { %843 = dma.hbm_to_vmem [thread:$0]  (!%p1198_p5), %s1362_s0, 128, %s246_s15, [#allocation5]  }
  0x40   : > { %s992_s13 = scalar_lea.hbm %s1366_s4, 2048 }
  0x41   : > { %p993_p2 = scmp.ne.s32.totalorder %s1366_s4, %s992_s13  ;;  %p999_p9 = scmp.lt.u32.totalorder %s992_s13, %s1366_s4 }
  0x43   : > { %p995_p3 = pnand %p993_p2, %p1215_p8 }
  0x45   : > { %p996_p6 = pneg %p995_p3 }
  0x47   : > { %p1001_p10 = pnand %p999_p9, %p996_p6 }
  0x49   : > { %1004 = shalt.err (!%p1001_p10)
}
  0x4a   : > { %s1005_s21 = scalar_lea.vmem %s275_s17, 2048  ;;  %p1013_p0 = scmp.lt.s32.totalorder %s275_s17, %s275_s17 }
  0x4b   : > { %p1006_p11 = scmp.ne.s32.totalorder %s275_s17, %s1005_s21  ;;  %p1014_p1 = scmp.lt.s32.totalorder %s1005_s21, %s1005_s21 }
  0x4d   : > { %p1008_p12 = pnand %p1006_p11, %p1215_p8  ;;  %p1015_p4 = por %p1014_p1, %p1013_p0 }
  0x4f   : > { %p1009_p13 = pneg %p1008_p12 }
  0x51   : > { %p1016_p7 = pnand %p1015_p4, %p1009_p13 }
  0x53   : > { %1019 = shalt.err (!%p1016_p7)
}
  0x54   : > { %s1117_s15 = smov 128   ;;  %s1118_s28 = smov 8  }
  0x55   : > { %849 = dma.hbm_to_vmem [thread:$0]  (!%p1198_p5), %s1366_s4, 2048, %s275_s17, [#allocation8], %s1117_s15, %s1117_s15, %s1118_s28  }
  0x56   : > { %p1380_p2 = scmp.ne.s32.totalorder %s1375_s9, 0 }
  0x57   : > { %p1381_p3 = scmp.ne.s32.totalorder (!%p1380_p2), %s1374_s8, 0 }
  0x58   : > { %293 = sbr.rel (%p1380_p2) target bundleno = 672 (0x2a0), region = 44 }
  0x5f   : > { %1085 = dma.done.wait (%p1381_p3), [#allocation5], 128  }
  0x60   : > { %1087 = vsyncadd (%p1381_p3), [#allocation5], 4294967168 }
  0x61   : > { %1089 = dma.done.wait (%p1381_p3), [#allocation8], 2176  }
  0x62   : > { %1091 = vsyncadd (%p1381_p3), [#allocation8], 4294965120  ;;  %p336_p8 = scmp.eq.s32.totalorder %s1102_s24, 0 }
  0x63   : > { %v1119_v0 = vmov (%p336_p8), 0.0  }
  0x64   : > { %341 = sbr.rel (!%p336_p8) target bundleno = 107 (0x6b), region = 60  ;;  %342 = vst [vmem:[#allocation2] sm:$0x1] (%p336_p8), %v1119_v0  ;;  %343 = vst [vmem:[#allocation3] sm:$0x1] (%p336_p8), %v1119_v0 }
  0x6b PF: > { %v905_v1 = vld [vmem:[#allocation7] sm:$0xff]   ;;  %v1120_v2 = vmov 0.0   ;;  %v344_v3 = vld [vmem:[#allocation4] sm:$0xff]  ;;  %vm1121_vm0 = vmmov 0   ;;  %vm354_vm1 = vcmask 130048   ;;  %p787_p5 = scmp.ne.s32.totalorder %s1102_s24, 0 }
  0x6c   : > { %814 = vmatprep.subr.bf16.mxu0 %v1120_v2  ;;  %816 = vmatprep.mubr.msk.bf16.mxu0 %vm1121_vm0, %v1120_v2  ;;  %v345_v4 = vpack.c.bf16 %v344_v3, %v344_v3  ;;  %v401_v19 = vld [vmem:[#allocation2] sm:$0x1] (!%p787_p5)  ;;  %v410_v22 = vld [vmem:[#allocation3] sm:$0x1] (!%p787_p5) }
  0x6d   : > { %815 = vmatpush3.bf16.msra.mxu0 %v905_v1 }
  0x70   : > { %817 = vmatmul.mubr.msk.bf16.vlgmr.msra.gmra.mrb[0].mxu0 %vm354_vm1, %v345_v4 }
 0x140   : > { %400 = sbr.rel (%p787_p5) target bundleno = 341 (0x155), region = 64 }
 0x143   : > { %v1282_v5 = vpop.f32.mrb[0].mxu0 }
 0x144   : > { %v818_v6 = vpop.f32.mrb[1].mxu0  ;;  %v402_v9 = vrot.slane (!%p787_p5), %v1282_v5, 4  ;;  %v411_v10 = vmul.f32 (!%p787_p5), %v1282_v5, %v1282_v5 }
 0x145   : > { %v395_v7 = vpop.f32.mrb[2].mxu0 }
 0x146   : > { %v819_v8 = vpop.f32.mrb[3].mxu0  ;;  %v403_v11 = vadd.f32 (!%p787_p5), %v402_v9, %v1282_v5  ;;  %v412_v12 = vrot.slane (!%p787_p5), %v411_v10, 4 }
 0x148   : > { %v404_v13 = vrot.slane %v403_v11, 2  ;;  %v413_v14 = vadd.f32 %v412_v12, %v411_v10 }
 0x14a   : > { %v405_v15 = vadd.f32 %v404_v13, %v403_v11  ;;  %v414_v16 = vrot.slane %v413_v14, 2 }
 0x14c   : > { %v406_v17 = vrot.slane %v405_v15, 1  ;;  %v415_v18 = vadd.f32 %v414_v16, %v413_v14 }
 0x14e   : > { %v407_v20 = vadd.f32 %v406_v17, %v405_v15  ;;  %v416_v21 = vrot.slane %v415_v18, 1 }
 0x150   : > { %v408_v23 = vadd.f32 %v407_v20, %v401_v19  ;;  %v417_v24 = vadd.f32 %v416_v21, %v415_v18 }
 0x152   : > { %409 = vst [vmem:[#allocation2] sm:$0x1] %v408_v23  ;;  %v418_v25 = vadd.f32 %v417_v24, %v410_v22 }
 0x154   : > { %419 = vst [vmem:[#allocation3] sm:$0x1] %v418_v25 }
 0x155 PF: > { %p788_p6 = scmp.ne.s32.totalorder %s1102_s24, 1 }
 0x156   : > { %v906_v26 = vld [vmem:[#allocation9 + $0x4] ss:$8 sps:$4 sm:$0xff] (!%p788_p6)   ;;  %v908_v27 = vld [vmem:[#allocation9] ss:$8 sps:$4 sm:$0xff] (!%p788_p6)   ;;  %v1122_v28 = vmov (!%p788_p6), 0   ;;  %v438_v47 = vlaneseq (!%p788_p6) }
 0x157   : > { %423 = sbr.rel (%p788_p6) target bundleno = 628 (0x274), region = 68  ;;  %595 = vmatprep.mubr.bf16.mxu0 (!%p788_p6), %v1122_v28  ;;  %563 = vmatprep.subr.bf16.mxu0 (!%p788_p6), %v906_v26  ;;  %v909_v29 = vld [vmem:[#allocation9 + $0x14] ss:$8 sps:$4 sm:$0xff] (!%p788_p6)   ;;  %v911_v30 = vld [vmem:[#allocation9 + $0x10] ss:$8 sps:$4 sm:$0xff] (!%p788_p6)  }
 0x158   : > { %564 = vmatpush1.bf16.msra.mxu0 (!%p788_p6), %v908_v27  ;;  %v912_v31 = vld [vmem:[#allocation9 + $0x24] ss:$8 sps:$4 sm:$0xff] (!%p788_p6)   ;;  %v914_v32 = vld [vmem:[#allocation9 + $0x20] ss:$8 sps:$4 sm:$0xff] (!%p788_p6)   ;;  %v915_v33 = vld [vmem:[#allocation9 + $0x34] ss:$8 sps:$4 sm:$0xff] (!%p788_p6)  }
 0x159   : > { %565 = vmatprep.subr.bf16.mxu0 (!%p788_p6), %v909_v29  ;;  %v424_v34 = vld [vmem:[#allocation2] sm:$0x1] (!%p788_p6)  ;;  %v917_v35 = vld [vmem:[#allocation9 + $0x30] ss:$8 sps:$4 sm:$0xff] (!%p788_p6)   ;;  %v920_v41 = vld [vmem:[#allocation9 + $0x40] ss:$8 sps:$4 sm:$0xff] (!%p788_p6)  }
 0x15a   : > { %v425_v36 = vmul.f32 (!%p788_p6), 0.125, %v424_v34  ;;  %v918_v38 = vld [vmem:[#allocation9 + $0x44] ss:$8 sps:$4 sm:$0xff] (!%p788_p6)   ;;  %v921_v43 = vld [vmem:[#allocation9 + $0x54] ss:$8 sps:$4 sm:$0xff] (!%p788_p6)   ;;  %v439_v50 = vshrl.u32 (!%p788_p6), %v438_v47, 7 }
 0x15b   : > { %v426_v37 = vld [vmem:[#allocation3] sm:$0x1] (!%p788_p6)  ;;  %v923_v45 = vld [vmem:[#allocation9 + $0x50] ss:$8 sps:$4 sm:$0xff] (!%p788_p6)   ;;  %v926_v48 = vld [vmem:[#allocation9 + $0x60] ss:$8 sps:$4 sm:$0xff] (!%p788_p6)  }
 0x15c   : > { %566 = vmatpush1.bf16.msra.mxu0 (!%p788_p6), %v911_v30  ;;  %v427_v39 = vmul.f32 (!%p788_p6), 0.125, %v426_v37  ;;  %v428_v40 = vmul.f32 (!%p788_p6), %v425_v36, %v425_v36  ;;  %v924_v46 = vld [vmem:[#allocation9 + $0x64] ss:$8 sps:$4 sm:$0xff] (!%p788_p6)   ;;  %v927_v49 = vld [vmem:[#allocation9 + $0x74] ss:$8 sps:$4 sm:$0xff] (!%p788_p6)   ;;  %v440_v53 = vsub.s32 (!%p788_p6), 0, %v439_v50 }
 0x15d   : > { %567 = vmatprep.subr.bf16.mxu0 (!%p788_p6), %v912_v31  ;;  %v929_v51 = vld [vmem:[#allocation9 + $0x70] ss:$8 sps:$4 sm:$0xff] (!%p788_p6)   ;;  %v430_v52 = vld [vmem:[%s1364_s2] sm:$0x1] (!%p788_p6)  ;;  %v479_v3 = vsub.s32 (!%p788_p6), 1, %v439_v50 }
 0x15e   : > { %v429_v42 = vsub.f32 %v427_v39, %v428_v40  ;;  %v434_v56 = vld [vmem:[%s1365_s3] sm:$0x1] }
 0x15f   : > { %v471_v2 = vld [vmem:[%s1367_s5] sm:$0x3] }
 0x160   : > { %568 = vmatpush1.bf16.msra.mxu0 %v914_v32  ;;  %v431_v44 = vadd.f32 1e-05, %v429_v42  ;;  %v476_v4 = vrot.slane %v471_v2, %v440_v53  ;;  %v480_v6 = vrot.slane %v471_v2, %v479_v3 }
 0x161   : > { %569 = vmatprep.subr.bf16.mxu0 %v915_v33 }
 0x162   : > { %930 = vrsqrt.f32 %v431_v44 }
 0x164   : > { %570 = vmatpush1.bf16.msra.mxu0 %v917_v35 }
 0x165   : > { %571 = vmatprep.subr.bf16.mxu0 %v918_v38 }
 0x168   : > { %572 = vmatpush1.bf16.msra.mxu0 %v920_v41 }
 0x169   : > { %573 = vmatprep.subr.bf16.mxu0 %v921_v43 }
 0x16c   : > { %574 = vmatpush1.bf16.msra.mxu0 %v923_v45  ;;  %v931_v54 = vpop.eup %930 }
 0x16d   : > { %575 = vmatprep.subr.bf16.mxu0 %v924_v46  ;;  %v433_v55 = vmul.f32 %v931_v54, %v430_v52 }
 0x16f   : > { %v435_v57 = vmul.f32 %v433_v55, %v425_v36  ;;  %v441_v58 = vrot.slane %v433_v55, %v440_v53 }
 0x170   : > { %576 = vmatpush1.bf16.msra.mxu0 %v926_v48 }
 0x171   : > { %577 = vmatprep.subr.bf16.mxu0 %v927_v49  ;;  %v436_v59 = vsub.f32 %v434_v56, %v435_v57  ;;  %v443_v60 = vmul.f32 %v441_v58, %v1282_v5 }
 0x173   : > { %v448_v61 = vrot.slane %v436_v59, %v440_v53 }
 0x174   : > { %578 = vmatpush1.bf16.msra.mxu0 %v929_v51 }
 0x175   : > { %v450_v62 = vadd.f32 %v448_v61, %v443_v60 }
 0x177   : > { %vm451_vm2 = vcmp.ge.f32.partialorder %v450_v62, 0.0  ;;  %v452_v63 = vmul.f32 0.1, %v450_v62 }
 0x179   : > { %v453_v0 = vsel %vm451_vm2, %v450_v62, %v452_v63 }
 0x17a   : > { %v454_v1 = vpack.c.bf16 %v453_v0, %v453_v0 }
 0x17c   : > { %596 = vmatmul.mubr.bf16.vlgmr.msra.gmra.mrb[0].mxu0 %v454_v1 }
 0x24f   : > { %v597_v7 = vpop.f32.mrb[0].mxu0 }
 0x250   : > { %v598_v8 = vadd.f32 %v597_v7, %v476_v4  ;;  %v599_v9 = vpop.f32.mrb[1].mxu0 }
 0x251   : > { %v600_v10 = vadd.f32 %v599_v9, %v480_v6  ;;  %v601_v11 = vpop.f32.mrb[2].mxu0 }
 0x252   : > { %604 = vst [vmem:[#allocation10] sm:$0xff] %v598_v8  ;;  %v602_v5 = vpop.f32.mrb[3].mxu0 }
 0x253   : > { %v606_v12 = vmin.f32 %v600_v10, 20.0  ;;  %vm605_vm4 = vcmp.gt.f32.partialorder %v600_v10, 20.0 }
 0x255   : > { %v607_v13 = vmul.f32 1.442695, %v606_v12 }
 0x257   : > { %932 = vpow2.f32 %v607_v13 }
 0x261   : > { %v933_v14 = vpop.eup %932 }
 0x262   : > { %v609_v15 = vadd.f32 1.0, %v933_v14  ;;  %v612_v16 = vmul.f32 -0.5, %v933_v14  ;;  %v615_v18 = vand.u32 2147483647, %v933_v14 }
 0x264   : > { %934 = vlog2.f32 %v609_v15  ;;  %v613_v17 = vadd.f32 1.0, %v612_v16  ;;  %vm616_vm3 = vcmp.lt.f32.partialorder %v615_v18, 0.0004427343 }
 0x266   : > { %v614_v21 = vmul.f32 %v933_v14, %v613_v17 }
 0x26e   : > { %v935_v19 = vpop.eup %934 }
 0x26f   : > { %v611_v20 = vmul.f32 0.6931472, %v935_v19 }
 0x271   : > { %v617_v22 = vsel %vm616_vm3, %v614_v21, %v611_v20 }
 0x272   : > { %v618_v23 = vsel %vm605_vm4, %v600_v10, %v617_v22 }
 0x273   : > { %619 = vst [vmem:[#allocation11] sm:$0xff] %v618_v23 }
 0x274 PF: > { %s1382_s29 = sadd.s32 4294967295, %s1110_s26   ;;  %s1123_s23 = smov [#allocation10]  }
 0x275   : > { %p1302_p9 = scmp.eq.s32.totalorder %s1382_s29, 1  ;;  %s640_s27 = sshll.u32 %s1123_s23, 4  ;;  %s641_s27 = int_to_ptr.vmem [resolvable:$true] %s640_s27 }
 0x276   : > { %s1124_s13 = smov [#allocation11]   ;;  %s1020_s16 = scalar_lea.vmem %s641_s27, 128 }
 0x277   : > { %s654_s14 = sshll.u32 %s1124_s13, 4  ;;  %p1021_p10 = scmp.ne.s32.totalorder %s641_s27, %s1020_s16  ;;  %s1306_s14 = int_to_ptr.vmem [resolvable:$true] %s654_s14 }
 0x278   : > { %s1026_s19 = scalar_lea.vmem %s641_s27, 256  ;;  %p1027_p13 = scmp.lt.s32.totalorder %s641_s27, %s641_s27 }
 0x279   : > { %p1022_p11 = pnand %p1021_p10, %p1302_p9  ;;  %p1028_p0 = scmp.lt.s32.totalorder %s1026_s19, %s1020_s16 }
 0x27b   : > { %p1023_p12 = pneg %p1022_p11  ;;  %p1029_p1 = por %p1028_p0, %p1027_p13 }
 0x27d   : > { %p1030_p4 = pnand %p1029_p1, %p1023_p12 }
 0x27f   : > { %1033 = shalt.err (!%p1030_p4)
}
 0x280   : > { %s1034_s15 = scalar_lea.hbm %s1368_s6, 128 }
 0x281   : > { %p1035_p7 = scmp.ne.s32.totalorder %s1368_s6, %s1034_s15  ;;  %p1040_p8 = scmp.lt.u32.totalorder %s1034_s15, %s1368_s6 }
 0x283   : > { %p1036_p2 = pnand %p1035_p7, %p1302_p9 }
 0x285   : > { %p1037_p3 = pneg %p1036_p2 }
 0x287   : > { %p1042_p5 = pnand %p1040_p8, %p1037_p3 }
 0x289   : > { %1045 = shalt.err (!%p1042_p5)
}
 0x28a   : > { %833 = dma.vmem_to_hbm [thread:$0]  (%p1302_p9), %s641_s27, 128, %s1368_s6, [#allocation6]  }
 0x28b   : > { %s1046_s10 = scalar_lea.vmem %s1306_s14, 128  ;;  %s1052_s18 = scalar_lea.vmem %s1306_s14, 256 }
 0x28c   : > { %p1047_p6 = scmp.ne.s32.totalorder %s1306_s14, %s1046_s10  ;;  %p1053_p12 = scmp.lt.s32.totalorder %s1306_s14, %s1306_s14 }
 0x28d   : > { %p1054_p13 = scmp.lt.s32.totalorder %s1052_s18, %s1046_s10 }
 0x28e   : > { %p1048_p10 = pnand %p1047_p6, %p1302_p9 }
 0x28f   : > { %p1055_p0 = por %p1054_p13, %p1053_p12 }
 0x290   : > { %p1049_p11 = pneg %p1048_p10 }
 0x292   : > { %p1056_p1 = pnand %p1055_p0, %p1049_p11 }
 0x294   : > { %1059 = shalt.err (!%p1056_p1)
}
 0x295   : > { %s1060_s23 = scalar_lea.hbm %s1369_s7, 128 }
 0x296   : > { %p1061_p4 = scmp.ne.s32.totalorder %s1369_s7, %s1060_s23  ;;  %p1066_p3 = scmp.lt.u32.totalorder %s1060_s23, %s1369_s7 }
 0x298   : > { %p1062_p7 = pnand %p1061_p4, %p1302_p9 }
 0x29a   : > { %p1063_p2 = pneg %p1062_p7 }
 0x29c   : > { %p1068_p8 = pnand %p1066_p3, %p1063_p2 }
 0x29e   : > { %1071 = shalt.err (!%p1068_p8)
}
 0x29f   : > { %835 = dma.vmem_to_hbm [thread:$0]  (%p1302_p9), %s1306_s14, 128, %s1369_s7, [#allocation12]  }
 0x2a0 PF: > { %p865_p5 = scmp.ge.s32.totalorder %s1110_s26, 2  ;;  %s1384_s15 = sadd.s32 4294967294, %s1110_s26  }
 0x2a1   : > { %p866_p6 = scmp.eq.s32.totalorder %s1384_s15, 1 }
 0x2a3   : > { %p851_p10 = pnand %p866_p6, %p865_p5 }
 0x2a5   : > { %1093 = dma.done.wait (!%p851_p10), [#allocation6], 128  }
 0x2a6   : > { %1095 = vsyncadd (!%p851_p10), [#allocation6], 4294967168 }
 0x2a7   : > { %1097 = dma.done.wait (!%p851_p10), [#allocation12], 128  }
 0x2a8   : > { %1099 = vsyncadd (!%p851_p10), [#allocation12], 4294967168  ;;  %s26_s26 = sadd.s32 1, %s1110_s26   ;;  %s1385_s24 = smov %s1106_s25 }
 0x2a9   : > { %p23_p11 = scmp.ge.s32.totalorder %s26_s26, 4   ;;  %s1386_s25 = smov %s1388_s11 }
 0x2ab   :  { %25 = sbr.rel (!%p23_p11) target bundleno = 7 (0x7), region = 119 }
 0x2b2   :  { %681 = vsyncpa [#allocation5], 1 }
 0x2b3   :  { %683 = vsyncpa [#allocation5 + $0x1], 1 }
 0x2b4   :  { %684 = vsyncpa [#allocation8], 1 }
 0x2b5   :  { %685 = vsyncpa [#allocation6], 1 }
 0x2b6   :  { %687 = vsyncpa [#allocation6 + $0x1], 1 }
 0x2b7   :  { %688 = vsyncpa [#allocation12], 1 }
 0x2b8   :  { %690 = vsyncpa [#allocation12 + $0x1], 1 }

</bundles_post_ra>
